<compile_context>
chip_gen: v7x
topology: tpu7x:2x2x1
jax: 0.10.0
libtpu: 0.0.40
codegen_flags: <defaults>
</compile_context>

<pallas_src>
import math

import jax
import jax.numpy as jnp
from jax.experimental import pallas as pl
from jax.experimental.pallas import tpu as pltpu


def cell_kernel(s_ref, h0_ref, adj_ref, w_ref, b_ref, fold_ref, o_ref):
    """One grid step == one group of graphs with the batch folded into rows.

    s_ref    : [M, 2H]   lane-concat [s0 | s1] for the group's M = (B/G)*N nodes
    h0_ref   : [M, 2H]   lane-duplicated [h0 | h0] (f32)
    adj_ref  : [M, M]    block-diagonal GCN-normalized adjacency of the group
    w_ref    : [2H, 2H]  blockdiag(W1, W2)
    b_ref    : [1, 2H]   [b1 | b2]
    fold_ref : [2H, H]   [[I_H]; [I_H]] -- folds the two H-halves via one matmul
    o_ref    : [M, H]
    """
    H = o_ref.shape[-1]

    # Fused per-step linear transform: one K=2H MXU matmul -> [xw1 | xw2].
    xw = jnp.dot(s_ref[...], w_ref[...], preferred_element_type=jnp.float32)

    # Fused aggregation: both steps share adj -> one matmul on the 2H-wide tile.
    # (xw is cast to adj's dtype so the bf16 path stays a bf16 MXU matmul.)
    agg = jnp.dot(adj_ref[...], xw.astype(adj_ref.dtype),
                  preferred_element_type=jnp.float32)

    # GraphEhanced (+h0) and bias; per-half activation via a lane-iota select
    # (lanes [0, H) -> relu for step 1, lanes [H, 2H) -> tanh for step 2),
    # avoiding any 32-lane slice/relayout.
    t = agg + b_ref[...] + h0_ref[...]
    lane = jax.lax.broadcasted_iota(jnp.int32, t.shape, dimension=1)
    e = jnp.where(lane < H, jnp.maximum(t, 0.0), jnp.tanh(t))

    # combine (self._concat == 'add'): e[:, :H] + e[:, H:] done as one tiny MXU
    # matmul with [[I]; [I]] (exact: 0/1 entries), instead of lane slices.
    o_ref[...] = jnp.dot(e, fold_ref[...],
                         preferred_element_type=jnp.float32).astype(o_ref.dtype)


def cell_forward(s0, s1, h0, adj, w1, b1, w2, b2, *, num_groups=None,
                 mxu_dtype=jnp.float32):
    """Batched Cell forward with the batch folded into the row dimension.

    s0, s1, h0 : [B, N, H]   node features (per graph)
    adj        : [B, N, N]   dense GCN-normalized adjacency per graph
    w1, w2     : [H, H]      GCN aggregator weights (shared across graphs)
    b1, b2     : [1, H]      GCN aggregator biases
    mxu_dtype  : dtype of the MXU operands (bf16 recommended on v6e/v7x);
                 accumulation stays f32.
    returns    : [B, N, H]   f32
    """
    B, N, H = s0.shape
    if num_groups is None:
        # 2 groups -> one per v7x TensorCore; harmless on single-TC v5e/v6e.
        num_groups = 2 if (B % 2 == 0 and B >= 2) else 1
    G = num_groups
    assert B % G == 0, "num_groups must divide the batch"
    Bg = B // G
    M = Bg * N  # rows per grid step (folded batch)

    # ---- wrapper-side packing (layout plumbing, tiny vs. the kernel) ----
    # Lane-concat features and lane-duplicated h0, folded to [G, M, 2H].
    s_cat = jnp.concatenate([s0, s1], axis=-1).reshape(G, M, 2 * H)
    h_cat = jnp.concatenate([h0, h0], axis=-1).reshape(G, M, 2 * H)
    h_cat = h_cat.astype(jnp.float32)

    # blockdiag(W1, W2) and packed bias [b1 | b2].
    zero = jnp.zeros((H, H), dtype=w1.dtype)
    w_bd = jnp.block([[w1, zero], [zero, w2]])                      # [2H, 2H]
    b_cat = jnp.concatenate([b1, b2], axis=-1).astype(jnp.float32)  # [1, 2H]

    # Block-diagonal adjacency per group: [G, M, M].
    adj_g = adj.reshape(G, Bg, N, N)
    adj_bd = jnp.einsum("gbij,bc->gbicj", adj_g,
                        jnp.eye(Bg, dtype=adj.dtype)).reshape(G, M, M)

    # Folding matrix [[I_H]; [I_H]] for the halves-add (kept f32 for exactness).
    eye_h = jnp.eye(H, dtype=jnp.float32)
    fold = jnp.concatenate([eye_h, eye_h], axis=0)                  # [2H, H]

    # Cast MXU operands (bf16 on v6e/v7x); accumulation stays f32 in-kernel.
    s_cat = s_cat.astype(mxu_dtype)
    w_bd = w_bd.astype(mxu_dtype)
    adj_bd = adj_bd.astype(mxu_dtype)

    grid_spec = pltpu.PrefetchScalarGridSpec(
        num_scalar_prefetch=0,
        grid=(G,),
        in_specs=[
            pl.BlockSpec((None, M, 2 * H), lambda g: (g, 0, 0)),   # s_cat
            pl.BlockSpec((None, M, 2 * H), lambda g: (g, 0, 0)),   # h_cat
            pl.BlockSpec((None, M, M), lambda g: (g, 0, 0)),       # adj_bd
            pl.BlockSpec((2 * H, 2 * H), lambda g: (0, 0)),        # w_bd  (shared)
            pl.BlockSpec((1, 2 * H), lambda g: (0, 0)),            # b_cat (shared)
            pl.BlockSpec((2 * H, H), lambda g: (0, 0)),            # fold  (shared)
        ],
        out_specs=pl.BlockSpec((None, M, H), lambda g: (g, 0, 0)),
    )

    # Advisory cost estimate for XLA's scheduler (free to add).
    flops = 2 * G * (M * (2 * H) * (2 * H)      # s_cat @ W_bd
                     + M * M * (2 * H)          # adj_bd @ xw
                     + M * (2 * H) * H)         # halves-fold matmul
    transcendentals = G * M * (2 * H)           # tanh evaluated on the fused tile
    bytes_accessed = int(
        s_cat.size * s_cat.dtype.itemsize
        + h_cat.size * h_cat.dtype.itemsize
        + adj_bd.size * adj_bd.dtype.itemsize
        + w_bd.size * w_bd.dtype.itemsize
        + b_cat.size * b_cat.dtype.itemsize
        + fold.size * fold.dtype.itemsize
        + B * N * H * 4)

    out = pl.pallas_call(
        cell_kernel,
        out_shape=jax.ShapeDtypeStruct((G, M, H), jnp.float32),
        grid_spec=grid_spec,
        compiler_params=pltpu.CompilerParams(
            dimension_semantics=("parallel",),   # group axis -> megacore on v7x
        ),
        cost_estimate=pl.CostEstimate(
            flops=flops,
            transcendentals=transcendentals,
            bytes_accessed=bytes_accessed,
        ),
    )(s_cat, h_cat, adj_bd, w_bd, b_cat, fold)

    return out.reshape(B, N, H)


def gcn_norm_adj(edge_index, num_nodes):
    """Dense D^-1/2 (A + I) D^-1/2 from a [2, E] edge_index (plain-JAX glue)."""
    src, dst = edge_index
    adj = jnp.zeros((num_nodes, num_nodes), jnp.float32).at[dst, src].set(1.0)
    adj = adj + jnp.eye(num_nodes, dtype=jnp.float32)            # self loops
    deg = adj.sum(axis=1)
    dinv = jnp.where(deg > 0, 1.0 / jnp.sqrt(deg), 0.0)
    return adj * dinv[:, None] * dinv[None, :]


def reference_forward(s0, s1, h0, adj, w1, b1, w2, b2):
    e1 = jnp.maximum(jnp.einsum("bij,bjh->bih", adj, s0 @ w1) + b1 + h0, 0.0)
    e2 = jnp.tanh(jnp.einsum("bij,bjh->bih", adj, s1 @ w2) + b2 + h0)
    return e1 + e2


if __name__ == "__main__":
    B = 4             # graphs, folded into 2 row-groups (one per v7x TC)
    N = 16            # nodes per graph
    HIDDEN = 32       # hidden_dim == out_dim

    key = jax.random.PRNGKey(0)
    k_s0, k_s1, k_h0, k_w1, k_b1, k_w2, k_b2 = jax.random.split(key, 7)

    # batched node-feature inputs (each_prev_out_dim = [HIDDEN, HIDDEN])
    s0 = jax.random.normal(k_s0, (B, N, HIDDEN), jnp.float32)
    s1 = jax.random.normal(k_s1, (B, N, HIDDEN), jnp.float32)
    h0 = jax.random.normal(k_h0, (B, N, HIDDEN), jnp.float32)

    # deterministic per-graph ring-like edge_index [2, E] (different stride per graph)
    adjs = []
    base = jnp.arange(N, dtype=jnp.int32)
    for b in range(B):
        dst = (base + 1 + b) % N
        edge_index = jnp.stack(
            [jnp.concatenate([base, dst]), jnp.concatenate([dst, base])], axis=0
        )
        adjs.append(gcn_norm_adj(edge_index, N))
    adj = jnp.stack(adjs, axis=0)                                # [B, N, N]

    # GCN aggregator parameters, init like reset_parameters: U(-stdv, stdv)
    stdv = 1.0 / math.sqrt(HIDDEN)
    w1 = jax.random.uniform(k_w1, (HIDDEN, HIDDEN), jnp.float32, -stdv, stdv)
    b1 = jax.random.uniform(k_b1, (1, HIDDEN), jnp.float32, -stdv, stdv)
    w2 = jax.random.uniform(k_w2, (HIDDEN, HIDDEN), jnp.float32, -stdv, stdv)
    b2 = jax.random.uniform(k_b2, (1, HIDDEN), jnp.float32, -stdv, stdv)

    ref = reference_forward(s0, s1, h0, adj, w1, b1, w2, b2)

    # f32 MXU operand path: semantically exact (tolerance covers f32 MXU emulation).
    out_f32 = cell_forward(s0, s1, h0, adj, w1, b1, w2, b2,
                           mxu_dtype=jnp.float32)
    jax.block_until_ready(out_f32)
    assert out_f32.shape == (B, N, HIDDEN)
    assert jnp.allclose(out_f32, ref, atol=1e-4, rtol=1e-4), "f32 mismatch vs reference"

    # bf16 MXU operand path (recommended on v6e/v7x): accumulation stays f32,
    # operand rounding => relaxed tolerance vs the f32 reference.
    out_bf16 = cell_forward(s0, s1, h0, adj, w1, b1, w2, b2,
                            mxu_dtype=jnp.bfloat16)
    jax.block_until_ready(out_bf16)
    assert jnp.allclose(out_bf16, ref, atol=1e-1, rtol=1e-1), "bf16 mismatch vs reference"

    print("KERNEL_OK")
</pallas_src>

<mosaic_0001>
module attributes {stable_mosaic.version = 11 : i64} {
  func.func @cell_kernel(%arg0: i32, %arg1: memref<1x32x64xf32, #tpu.memory_space<vmem>>, %arg2: memref<1x32x64xf32, #tpu.memory_space<vmem>>, %arg3: memref<1x32x32xf32, #tpu.memory_space<vmem>>, %arg4: memref<64x64xf32, #tpu.memory_space<vmem>>, %arg5: memref<1x64xf32, #tpu.memory_space<vmem>>, %arg6: memref<64x32xf32, #tpu.memory_space<vmem>>, %arg7: memref<1x32x32xf32, #tpu.memory_space<vmem>>) attributes {dimension_semantics = [#tpu.dimension_semantics<parallel>], iteration_bounds = array<i64: 2>, scalar_prefetch = 0 : i64, scratch_operands = 0 : i64, tpu.core_type = #tpu.core_type<tc>, window_params = [{transform_indices = @transform_0, window_bounds = array<i64: 1, 32, 64>}, {transform_indices = @transform_1, window_bounds = array<i64: 1, 32, 64>}, {transform_indices = @transform_2, window_bounds = array<i64: 1, 32, 32>}, {pipeline_mode = #tpu.pipeline_mode<synchronous>, transform_indices = @transform_3, window_bounds = array<i64: 64, 64>}, {pipeline_mode = #tpu.pipeline_mode<synchronous>, transform_indices = @transform_4, window_bounds = array<i64: 1, 64>}, {pipeline_mode = #tpu.pipeline_mode<synchronous>, transform_indices = @transform_5, window_bounds = array<i64: 64, 32>}, {transform_indices = @transform_6, window_bounds = array<i64: 1, 32, 32>}]} {
    %c0 = arith.constant 0 : index
    %c0_0 = arith.constant 0 : index
    %c0_1 = arith.constant 0 : index
    %0 = vector.load %arg1[%c0, %c0_0, %c0_1] : memref<1x32x64xf32, #tpu.memory_space<vmem>>, vector<1x32x64xf32>
    %1 = vector.shape_cast %0 : vector<1x32x64xf32> to vector<32x64xf32>
    %c0_2 = arith.constant 0 : index
    %c0_3 = arith.constant 0 : index
    %2 = vector.load %arg4[%c0_2, %c0_3] : memref<64x64xf32, #tpu.memory_space<vmem>>, vector<64x64xf32>
    %cst = arith.constant dense<0.000000e+00> : vector<32x64xf32>
    %3 = tpu.matmul %1, %2, %cst {dimension_numbers = #tpu.dot_dimension_numbers<[1], [0], [0], [1], [0, 0, 1, 1], [], []>} : vector<32x64xf32>, vector<64x64xf32>, vector<32x64xf32> -> vector<32x64xf32>
    %c0_4 = arith.constant 0 : index
    %c0_5 = arith.constant 0 : index
    %c0_6 = arith.constant 0 : index
    %4 = vector.load %arg3[%c0_4, %c0_5, %c0_6] : memref<1x32x32xf32, #tpu.memory_space<vmem>>, vector<1x32x32xf32>
    %5 = vector.shape_cast %4 : vector<1x32x32xf32> to vector<32x32xf32>
    %cst_7 = arith.constant dense<0.000000e+00> : vector<32x64xf32>
    %6 = tpu.matmul %5, %3, %cst_7 {dimension_numbers = #tpu.dot_dimension_numbers<[1], [0], [0], [1], [0, 0, 1, 1], [], []>} : vector<32x32xf32>, vector<32x64xf32>, vector<32x64xf32> -> vector<32x64xf32>
    %c0_8 = arith.constant 0 : index
    %c0_9 = arith.constant 0 : index
    %7 = vector.load %arg5[%c0_8, %c0_9] : memref<1x64xf32, #tpu.memory_space<vmem>>, vector<1x64xf32>
    %8 = vector.broadcast %7 : vector<1x64xf32> to vector<32x64xf32>
    %9 = arith.addf %6, %8 : vector<32x64xf32>
    %c0_10 = arith.constant 0 : index
    %c0_11 = arith.constant 0 : index
    %c0_12 = arith.constant 0 : index
    %10 = vector.load %arg2[%c0_10, %c0_11, %c0_12] : memref<1x32x64xf32, #tpu.memory_space<vmem>>, vector<1x32x64xf32>
    %11 = vector.shape_cast %10 : vector<1x32x64xf32> to vector<32x64xf32>
    %12 = arith.addf %9, %11 : vector<32x64xf32>
    %13 = tpu.iota {dimensions = array<i32: 1>} : vector<32x64xi32>
    %c32_i32 = arith.constant 32 : i32
    %14 = vector.broadcast %c32_i32 : i32 to vector<32x64xi32>
    %15 = arith.cmpi slt, %13, %14 : vector<32x64xi32>
    %cst_13 = arith.constant 0.000000e+00 : f32
    %16 = vector.broadcast %cst_13 : f32 to vector<32x64xf32>
    %17 = arith.maximumf %12, %16 : vector<32x64xf32>
    %18 = math.tanh %12 : vector<32x64xf32>
    %19 = arith.select %15, %17, %18 : vector<32x64xi1>, vector<32x64xf32>
    %c0_14 = arith.constant 0 : index
    %c0_15 = arith.constant 0 : index
    %20 = vector.load %arg6[%c0_14, %c0_15] : memref<64x32xf32, #tpu.memory_space<vmem>>, vector<64x32xf32>
    %cst_16 = arith.constant dense<0.000000e+00> : vector<32x32xf32>
    %21 = tpu.matmul %19, %20, %cst_16 {dimension_numbers = #tpu.dot_dimension_numbers<[1], [0], [0], [1], [0, 0, 1, 1], [], []>} : vector<32x64xf32>, vector<64x32xf32>, vector<32x32xf32> -> vector<32x32xf32>
    %c0_17 = arith.constant 0 : index
    %c0_18 = arith.constant 0 : index
    %c0_19 = arith.constant 0 : index
    %22 = vector.load %arg7[%c0_17, %c0_18, %c0_19] : memref<1x32x32xf32, #tpu.memory_space<vmem>>, vector<1x32x32xf32>
    %23 = vector.shape_cast %22 : vector<1x32x32xf32> to vector<32x32xf32>
    %24 = vector.shape_cast %21 : vector<32x32xf32> to vector<1x32x32xf32>
    tpu.vector_store %arg7[%c0_17, %c0_18, %c0_19], %24 {strides = array<i32>} : memref<1x32x32xf32, #tpu.memory_space<vmem>>, vector<1x32x32xf32>,
    return
  }
  func.func @transform_0(%arg0: i32) -> (i32, i32, i32) {
    %c0_i32 = arith.constant 0 : i32
    %c0_i32_0 = arith.constant 0 : i32
    %c0_i32_1 = arith.constant 0 : i32
    return %arg0, %c0_i32, %c0_i32_0 : i32, i32, i32
  }
  func.func @transform_1(%arg0: i32) -> (i32, i32, i32) {
    %c0_i32 = arith.constant 0 : i32
    %c0_i32_0 = arith.constant 0 : i32
    %c0_i32_1 = arith.constant 0 : i32
    return %arg0, %c0_i32, %c0_i32_0 : i32, i32, i32
  }
  func.func @transform_2(%arg0: i32) -> (i32, i32, i32) {
    %c0_i32 = arith.constant 0 : i32
    %c0_i32_0 = arith.constant 0 : i32
    %c0_i32_1 = arith.constant 0 : i32
    return %arg0, %c0_i32, %c0_i32_0 : i32, i32, i32
  }
  func.func @transform_3(%arg0: i32) -> (i32, i32) {
    %c0_i32 = arith.constant 0 : i32
    %c0_i32_0 = arith.constant 0 : i32
    %c0_i32_1 = arith.constant 0 : i32
    return %c0_i32, %c0_i32_0 : i32, i32
  }
  func.func @transform_4(%arg0: i32) -> (i32, i32) {
    %c0_i32 = arith.constant 0 : i32
    %c0_i32_0 = arith.constant 0 : i32
    %c0_i32_1 = arith.constant 0 : i32
    return %c0_i32, %c0_i32_0 : i32, i32
  }
  func.func @transform_5(%arg0: i32) -> (i32, i32) {
    %c0_i32 = arith.constant 0 : i32
    %c0_i32_0 = arith.constant 0 : i32
    %c0_i32_1 = arith.constant 0 : i32
    return %c0_i32, %c0_i32_0 : i32, i32
  }
  func.func @transform_6(%arg0: i32) -> (i32, i32, i32) {
    %c0_i32 = arith.constant 0 : i32
    %c0_i32_0 = arith.constant 0 : i32
    %c0_i32_1 = arith.constant 0 : i32
    return %arg0, %c0_i32, %c0_i32_0 : i32, i32, i32
  }
}

</mosaic_0001>

<bundles_post_ra>
// kernel: tpu_custom_call.1
= control target key start
LH: loop header
LB: loop body
LE: loop exit
PB: predicated region body
PF: predicated region fallthrough
CT: control target
= control target key end

     0   :  { %s1594_s0 = inlined_call_operand.vmem [shape: f32[2,32,64], index: 0, kind: input, shape index: {}]   ;;  %s1595_s1 = inlined_call_operand.hbm [shape: f32[2,32,64], index: 1, kind: input, shape index: {}]   ;;  %s1596_s2 = inlined_call_operand.hbm [shape: f32[2,32,32], index: 2, kind: input, shape index: {}]   ;;  %s1597_s3 = inlined_call_operand.hbm [shape: f32[64,64], index: 3, kind: input, shape index: {}]   ;;  %s1598_s4 = inlined_call_operand.vmem [shape: f32[1,64], index: 4, kind: input, shape index: {}]   ;;  %s1599_s5 = inlined_call_operand.vmem [shape: f32[64,32], index: 5, kind: input, shape index: {}]   ;;  %s1600_s6 = inlined_call_operand.hbm [shape: f32[2,32,32], index: 6, kind: output, shape index: {}]  }
   0x1   :  { %1611 = sst [smem:[#allocation16_spill]] %s1595_s1 }
   0x2   :  { %1612 = sst [smem:[#allocation17_spill]] %s1597_s3 }
   0x3   :  { %11 = vsyncpa [#allocation3], 0 }
   0x4   :  { %13 = vsyncpa [#allocation3 + $0x1], 0 }
   0x5   :  { %14 = vsyncpa [#allocation6], 0 }
   0x6   :  { %16 = vsyncpa [#allocation6 + $0x1], 0 }
   0x7   :  { %17 = vsyncpa [#allocation4], 0 }
   0x8   :  { %19 = vsyncpa [#allocation4 + $0x1], 0  ;;  %s1276_s21 = smov 0   ;;  %s1278_s22 = smov 0  }
   0x9   :  { %s1280_s23 = smov 0   ;;  %s1282_s24 = smov 0  }
   0xa LB: > { %1613 = sst [smem:[#allocation13_spill]] %s1227_s23  ;;  %s1297_s25 = sadd.s32 4294967295, %s1231_s24   ;;  %s1231_s24 = sphi %s1282_s24, %s1633_s24   ;;  %s1227_s23 = sphi %s1280_s23, %s1635_s23   ;;  %s1223_s22 = sphi %s1278_s22, %s1637_s22   ;;  %s1219_s21 = sphi %s1276_s21, %s1636_s21  }
   0xb   : > { %s826_s26 = sadd.s32 4294967294, %s1231_s24   ;;  %p71_p0 = scmp.ne.s32.totalorder %s1223_s22, %s1219_s21 }
   0xc   : > { %p1601_p1 = scmp.eq.s32.totalorder %s1297_s25, 0  ;;  %p190_p3 = scmp.eq.s32.totalorder %s826_s26, 1 }
   0xd   : > { %p827_p5 = scmp.ge.s32.totalorder %s1231_s24, 1  ;;  %p197_p7 = scmp.lt.s32.totalorder %s1231_s24, 3 }
   0xe   : > { %p1306_p4 = por %p1601_p1, %p71_p0  ;;  %p1311_p6 = por %p190_p3, %p71_p0 }
   0xf   : > { %p1316_p8 = pnand %p827_p5, %p197_p7  ;;  %s1233_s30 = smov [#allocation7]  }
  0x10   : > { %s1614_s27 = scalar_select %p1306_p4, 1, 0 }
  0x11   : > { %s1615_s28 = scalar_select %p1311_p6, 1, 0 }
  0x12   : > { %s1616_s29 = scalar_select %p1316_p8, 1, 0 }
  0x13   : > { %s209_s7 = sshll.u32 %s1233_s30, 4  ;;  %p1005_p9 = pneg %p1316_p8  ;;  %s1320_s7 = int_to_ptr.vmem [resolvable:$true] %s209_s7 }
  0x14   : > { %s1332_s9 = sadd.s32 1, %s1231_s24   ;;  %s58_s10 = sadd.s32 1, %s1227_s23 }
  0x15   : > { %p1327_p11 = pnand %p1005_p9, %p1601_p1  ;;  %1618 = sst [smem:[#allocation14_spill]] %s1332_s9 }
  0x16   : > { %s55_s11 = ssub.s32 %s1231_s24, %s1332_s9  ;;  %s1619_s3 = sld [smem:[#allocation17_spill]] }
  0x17   : > { %p1071_p13 = pneg %p1327_p11 }
  0x1c   : > { %s1069_s14 = scalar_lea.hbm %s1619_s3, 1024 }
  0x1d   : > { %p1070_p12 = scmp.ne.s32.totalorder %s1619_s3, %s1069_s14  ;;  %p1076_p5 = scmp.lt.u32.totalorder %s1069_s14, %s1619_s3 }
  0x1f   : > { %p1072_p0 = pnand %p1071_p13, %p1070_p12 }
  0x21   : > { %p1073_p3 = pneg %p1072_p0 }
  0x23   : > { %p1078_p7 = pnand %p1076_p5, %p1073_p3 }
  0x25   : > { %1081 = shalt.err (!%p1078_p7)
}
  0x26   : > { %s1082_s19 = scalar_lea.vmem %s1320_s7, 1024  ;;  %p1090_p2 = scmp.lt.s32.totalorder %s1320_s7, %s1320_s7 }
  0x27   : > { %p1083_p9 = scmp.ne.s32.totalorder %s1320_s7, %s1082_s19  ;;  %p1091_p6 = scmp.lt.s32.totalorder %s1082_s19, %s1082_s19 }
  0x29   : > { %p1085_p10 = pnand %p1083_p9, %p1071_p13  ;;  %p1092_p4 = por %p1091_p6, %p1090_p2 }
  0x2b   : > { %p1086_p1 = pneg %p1085_p10 }
  0x2d   : > { %p1093_p8 = pnand %p1092_p4, %p1086_p1 }
  0x2f   : > { %1096 = shalt.err (!%p1093_p8)
}
  0x30   : > { %s1604_s20 = smov 128   ;;  %s1606_s26 = smov 8  }
  0x31   : > { %1008 = dma.hbm_to_vmem [thread:$0]  (!%p1327_p11), %s1619_s3, 1024, %s1320_s7, [#allocation6], %s1604_s20, %s1604_s20, %s1606_s26  }
  0x32   : > { %p56_p1 = scmp.eq.s32.totalorder %s55_s11, 0  ;;  %p65_p2 = scmp.ne.s32.totalorder %s1227_s23, %s1223_s22 }
  0x33   : > { %p66_p4 = scmp.eq.s32.totalorder %s1231_s24, 0  ;;  %p1021_p6 = scmp.lt.s32.totalorder %s1231_s24, 2 }
  0x34   : > { %s1366_s13 = scalar_select %p56_p1, %s1227_s23, %s58_s10  }
  0x35   : > { %p67_p8 = por %p66_p4, %p65_p2  ;;  %p1621_p10 = scmp.eq.s32.totalorder %s1297_s25, 1 }
  0x36   : > { %1620 = sst [smem:[#allocation15_spill]] %s1366_s13  ;;  %s237_s8 = sand.u32 1, %s1227_s23  }
  0x37   : > { %p1370_p12 = por %p1621_p10, %p65_p2  ;;  %s861_s15 = sshll.u32 %s1231_s24, 9 }
  0x38   : > { %s1376_s16 = sshll.u32 %s237_s8, 5  ;;  %s1623_s1 = sld [smem:[#allocation16_spill]] }
  0x39   : > { %s241_s10 = scalar_lea.vmem [#allocation2], %s1376_s16  ;;  %p1384_p11 = pnand %p1021_p6, %p67_p8 }
  0x3a   : > { %s248_s11 = sshll.u32 %s241_s10, 4  ;;  %s1393_s17 = scalar_lea.hbm %s1596_s2, %s861_s15  ;;  %s1388_s11 = int_to_ptr.vmem [resolvable:$true] %s248_s11 }
  0x3b   : > { %s1395_s18 = scalar_lea.sflag [#allocation3], %s237_s8  ;;  %p1099_p0 = pneg %p1384_p11 }
  0x3e   : > { %s1381_s7 = scalar_lea.hbm %s1623_s1, %s861_s15  ;;  %s1102_s3 = scalar_lea.hbm %s1623_s1, 1024 }
  0x3f   : > { %s1097_s20 = scalar_lea.hbm %s1381_s7, 512  ;;  %p1103_p7 = scmp.lt.u32.totalorder %s1381_s7, %s1623_s1 }
  0x40   : > { %p1098_p13 = scmp.ne.s32.totalorder %s1381_s7, %s1097_s20  ;;  %p1104_p9 = scmp.lt.u32.totalorder %s1102_s3, %s1097_s20 }
  0x41   : > { %p1106_p2 = scmp.lt.u32.totalorder %s1097_s20, %s1381_s7 }
  0x42   : > { %p1100_p3 = pnand %p1099_p0, %p1098_p13  ;;  %p1105_p1 = por %p1104_p9, %p1103_p7 }
  0x44   : > { %p1101_p5 = pneg %p1100_p3  ;;  %p1107_p4 = por %p1106_p2, %p1105_p1 }
  0x46   : > { %p1108_p6 = pnand %p1107_p4, %p1101_p5 }
  0x48   : > { %1111 = shalt.err (!%p1108_p6)
}
  0x49   : > { %s1112_s8 = scalar_lea.vmem %s1388_s11, 512  ;;  %s1236_s26 = smov [#allocation2]  }
  0x4a   : > { %p1113_p8 = scmp.ne.s32.totalorder %s1388_s11, %s1112_s8  ;;  %s1117_s15 = sshll.u32 %s1236_s26, 4  ;;  %s1118_s15 = int_to_ptr.vmem [resolvable:$false] %s1117_s15 }
  0x4b   : > { %s1119_s23 = scalar_lea.vmem %s1118_s15, 1024  ;;  %p1120_p3 = scmp.lt.s32.totalorder %s1388_s11, %s1118_s15 }
  0x4c   : > { %p1115_p10 = pnand %p1113_p8, %p1099_p0  ;;  %p1121_p7 = scmp.lt.s32.totalorder %s1119_s23, %s1112_s8 }
  0x4e   : > { %p1116_p13 = pneg %p1115_p10  ;;  %p1122_p9 = por %p1121_p7, %p1120_p3 }
  0x50   : > { %p1123_p1 = pnand %p1122_p9, %p1116_p13 }
  0x52   : > { %1126 = shalt.err (!%p1123_p1)
}
  0x53   : > { %s1625_s3 = smov 8   ;;  %s1626_s20 = smov 128  }
  0x54   : > { %1012 = dma.hbm_to_vmem [thread:$0]  (!%p1384_p11), %s1381_s7, 512, %s1388_s11, %s1395_s18, %s1626_s20, %s1626_s20, %s1625_s3  }
  0x55   : > { %s262_s13 = scalar_lea.vmem [#allocation5], %s1376_s16  ;;  %s258_s12 = sand.u32 1, %s1231_s24  }
  0x56   : > { %s269_s30 = sshll.u32 %s262_s13, 4  ;;  %s1430_s10 = scalar_lea.sflag [#allocation6], %s258_s12  ;;  %s1428_s30 = int_to_ptr.vmem [resolvable:$true] %s269_s30 }
  0x57   : > { %s1127_s8 = scalar_lea.hbm %s1393_s17, 512  ;;  %s1132_s23 = scalar_lea.hbm %s1596_s2, 1024 }
  0x58   : > { %p1128_p5 = scmp.ne.s32.totalorder %s1393_s17, %s1127_s8  ;;  %p1133_p6 = scmp.lt.u32.totalorder %s1393_s17, %s1596_s2 }
  0x59   : > { %p1134_p8 = scmp.lt.u32.totalorder %s1132_s23, %s1127_s8  ;;  %p1136_p13 = scmp.lt.u32.totalorder %s1127_s8, %s1393_s17 }
  0x5a   : > { %p1130_p2 = pnand %p1128_p5, %p1099_p0 }
  0x5b   : > { %p1135_p10 = por %p1134_p8, %p1133_p6 }
  0x5c   : > { %p1131_p4 = pneg %p1130_p2 }
  0x5d   : > { %p1137_p3 = por %p1136_p13, %p1135_p10 }
  0x5f   : > { %p1138_p7 = pnand %p1137_p3, %p1131_p4 }
  0x61   : > { %1141 = shalt.err (!%p1138_p7)
}
  0x62   : > { %s1142_s16 = scalar_lea.vmem %s1428_s30, 512  ;;  %s1237_s7 = smov [#allocation5]  }
  0x63   : > { %p1143_p9 = scmp.ne.s32.totalorder %s1428_s30, %s1142_s16  ;;  %s1147_s11 = sshll.u32 %s1237_s7, 4  ;;  %s1148_s11 = int_to_ptr.vmem [resolvable:$false] %s1147_s11 }
  0x64   : > { %s1149_s1 = scalar_lea.vmem %s1148_s11, 1024  ;;  %p1150_p2 = scmp.lt.s32.totalorder %s1428_s30, %s1148_s11 }
  0x65   : > { %p1145_p1 = pnand %p1143_p9, %p1099_p0  ;;  %p1151_p6 = scmp.lt.s32.totalorder %s1149_s1, %s1142_s16 }
  0x67   : > { %p1146_p5 = pneg %p1145_p1  ;;  %p1152_p8 = por %p1151_p6, %p1150_p2 }
  0x69   : > { %p1153_p10 = pnand %p1152_p8, %p1146_p5 }
  0x6b   : > { %1156 = shalt.err (!%p1153_p10)
}
  0x6c   : > { %1015 = dma.hbm_to_vmem [thread:$0]  (!%p1384_p11), %s1393_s17, 512, %s1428_s30, %s1430_s10, %s1626_s20, %s1626_s20, %s1625_s3  }
  0x6d   : > { %p1627_p0 = scmp.ne.s32.totalorder %s1616_s29, 0 }
  0x6e   : > { %s1462_s9 = sand.u32 (!%p1627_p0), 1, %s1223_s22   ;;  %p1628_p4 = scmp.ne.s32.totalorder (!%p1627_p0), %s1614_s27, 0 }
  0x6f   : > { %281 = sbr.rel (%p1627_p0) target bundleno = 829 (0x33d), region = 44  ;;  %s1465_s18 = sshll.u32 (!%p1627_p0), %s1462_s9, 5 }
  0x70   : > { %s284_s19 = scalar_lea.sflag (!%p1627_p0), [#allocation3], %s1462_s9  ;;  %s1469_s13 = scalar_lea.vmem (!%p1627_p0), [#allocation2], %s1465_s18 }
  0x76   : > { %1202 = dma.done.wait (%p1628_p4), %s284_s19, 512  }
  0x77   : > { %1204 = vsyncadd (%p1628_p4), %s284_s19, 4294966784  ;;  %s292_s29 = sand.u32 1, %s1297_s25   ;;  %s1477_s3 = scalar_lea.vmem [#allocation5], %s1465_s18 }
  0x78   : > { %s293_s17 = scalar_lea.sflag [#allocation6], %s292_s29 }
  0x79   : > { %1206 = dma.done.wait (%p1628_p4), %s293_s17, 512  }
  0x7a   : > { %1208 = vsyncadd (%p1628_p4), %s293_s17, 4294966784  ;;  %p1629_p11 = scmp.eq.s32.totalorder %s1297_s25, 0 }
  0x7c   : > { %1210 = dma.done.wait (%p1629_p11), [#allocation6], 1024   ;;  %p1630_p13 = pmov %p1629_p11 }
  0x7d   : > { %p339_p3 = scmp.lt.s32.totalorder %s1297_s25, 1  ;;  %v348_v0 = vld [vmem:[#allocation7] sm:$0xff]  ;;  %v349_v1 = vld [vmem:[#allocation7 + $0x8] sm:$0xff]  ;;  %v350_v2 = vld [vmem:[#allocation7 + $0x10] sm:$0xff]  ;;  %vm356_vm0 = vcmask 523264   ;;  %vm465_vm1 = vcmask 261120   ;;  %v571_v53 = vlaneseq }
  0x7e   : > { %1212 = vsyncadd (%p1630_p13), [#allocation6], 4294966272  ;;  %v955_v3 = vpack.c.bf16 %v349_v1, %v348_v0  ;;  %v351_v4 = vld [vmem:[#allocation7 + $0x18] sm:$0xff]  ;;  %v352_v6 = vld [vmem:[#allocation7 + $0x20] sm:$0xff]  ;;  %s864_s15 = sshll.u32 %s1297_s25, 9  ;;  %s1238_s11 = smov [#allocation8]  }
  0x7f   : > { %s340_s20 = scalar_select %p339_p3, %s1297_s25, 1  ;;  %v959_v5 = vpack.c.bf16 %v351_v4, %v350_v2  ;;  %v353_v7 = vld [vmem:[#allocation7 + $0x28] sm:$0xff]  ;;  %v354_v10 = vld [vmem:[#allocation7 + $0x30] sm:$0xff]  ;;  %v355_v11 = vld [vmem:[#allocation7 + $0x38] sm:$0xff]  ;;  %v572_v56 = vand.u32 127, %v571_v53 }
  0x80   : > { %956 = vmatprep.subr.bf16.mxu0 %v955_v3  ;;  %v963_v9 = vpack.c.bf16 %v353_v7, %v352_v6  ;;  %v967_v12 = vpack.c.bf16 %v355_v11, %v354_v10  ;;  %v454_v16 = vld [vmem:[%s1477_s3] sm:$0xff]  ;;  %v455_v23 = vld [vmem:[%s1477_s3 + $0x8] sm:$0xff]  ;;  %v456_v24 = vld [vmem:[%s1477_s3 + $0x10] sm:$0xff]  ;;  %s1548_s7 = scalar_lea.hbm %s1600_s6, %s864_s15  ;;  %s696_s25 = scalar_lea.sflag [#allocation4], %s1462_s9 }
  0x81   : > { %s863_s30 = sshll.u32 %s340_s20, 5  ;;  %958 = vmatpush3.bf16.msra.mxu0 %v955_v3  ;;  %927 = vmatprep.mubr.msk.f32.mxu1 %vm465_vm1, %v454_v16  ;;  %v457_v25 = vld [vmem:[%s1477_s3 + $0x18] sm:$0xff]  ;;  %v586_v26 = vld [vmem:[%s1599_s5] sm:$0xff]  ;;  %v587_v27 = vld [vmem:[%s1599_s5 + $0x8] sm:$0xff]  ;;  %vm573_vm2 = vcmp.lt.s32.totalorder %v572_v56, 32  ;;  %s1161_s1 = sshll.u32 %s1238_s11, 4  ;;  %s1162_s1 = int_to_ptr.vmem [resolvable:$false] %s1161_s1 }
  0x82   : > { %s343_s8 = scalar_lea.vmem %s1594_s0, %s863_s30  ;;  %960 = vmatprep.subr.bf16.mxu0 %v959_v5  ;;  %v979_v28 = vpack.c.bf16 %v587_v27, %v586_v26  ;;  %v588_v29 = vld [vmem:[%s1599_s5 + $0x10] sm:$0xff]  ;;  %v589_v30 = vld [vmem:[%s1599_s5 + $0x18] sm:$0xff]  ;;  %v590_v32 = vld [vmem:[%s1599_s5 + $0x20] sm:$0xff]  ;;  %s1163_s19 = scalar_lea.vmem %s1162_s1, 1024 }
  0x83   : > { %v344_v8 = vld [vmem:[%s343_s8] sm:$0xff]  ;;  %v345_v13 = vld [vmem:[%s343_s8 + $0x8] sm:$0xff]  ;;  %v346_v14 = vld [vmem:[%s343_s8 + $0x10] sm:$0xff]  ;;  %v983_v31 = vpack.c.bf16 %v589_v30, %v588_v29 }
  0x84   : > { %913 = vmatprep.mubr.msk.f32.mxu0 %vm356_vm0, %v344_v8  ;;  %v347_v15 = vld [vmem:[%s343_s8 + $0x18] sm:$0xff]  ;;  %v591_v33 = vld [vmem:[%s1599_s5 + $0x28] sm:$0xff]  ;;  %v592_v35 = vld [vmem:[%s1599_s5 + $0x30] sm:$0xff] }
  0x85   : > { %962 = vmatpush3.bf16.msra.mxu0 %v959_v5  ;;  %v987_v34 = vpack.c.bf16 %v591_v33, %v590_v32  ;;  %v593_v36 = vld [vmem:[%s1599_s5 + $0x38] sm:$0xff]  ;;  %v847_v38 = vld [vmem:[%s1598_s4] ss:$0 sm:$0xff]  ;;  %v564_v40 = vld [vmem:[%s1469_s13 + $0x8] sm:$0xff] }
  0x86   : > { %964 = vmatprep.subr.bf16.mxu0 %v963_v9  ;;  %v991_v37 = vpack.c.bf16 %v593_v36, %v592_v35  ;;  %v563_v43 = vld [vmem:[%s1469_s13] sm:$0xff]  ;;  %v566_v48 = vld [vmem:[%s1469_s13 + $0x18] sm:$0xff]  ;;  %v565_v51 = vld [vmem:[%s1469_s13 + $0x10] sm:$0xff]  ;;  %s338_s13 = scalar_lea.vmem [#allocation8], %s1465_s18 }
  0x87   : > { %s709_s26 = sshll.u32 %s338_s13, 4  ;;  %s1542_s26 = int_to_ptr.vmem [resolvable:$true] %s709_s26 }
  0x88   : > { %s1157_s18 = scalar_lea.vmem %s1542_s26, 512  ;;  %p1164_p5 = scmp.lt.s32.totalorder %s1542_s26, %s1162_s1 }
  0x89   : > { %966 = vmatpush3.bf16.msra.mxu0 %v963_v9  ;;  %p1158_p7 = scmp.ne.s32.totalorder %s1542_s26, %s1157_s18  ;;  %p1165_p2 = scmp.lt.s32.totalorder %s1163_s19, %s1157_s18 }
  0x8a   : > { %968 = vmatprep.subr.bf16.mxu0 %v967_v12 }
  0x8b   : > { %p1159_p9 = pnand %p1158_p7, %p1370_p12  ;;  %p1166_p6 = por %p1165_p2, %p1164_p5 }
  0x8d   : > { %970 = vmatpush3.bf16.msra.mxu0 %v967_v12  ;;  %p1160_p1 = pneg %p1159_p9 }
  0x8f   : > { %p1167_p8 = pnand %p1166_p6, %p1160_p1 }
  0x90   : > { %914 = vmatmul.mubr.msk.f32.vlgmr.msra.gmra.mrb[0].mxu0 %vm356_vm0, %v345_v13 }
  0x91   : > { %916 = vmatprep.mubr.msk.f32.mxu0 %vm356_vm0, %v346_v14 }
  0x94   : > { %917 = vmatmul.mubr.msk.f32.gmra.mrb[2].mxu0 %vm356_vm0, %v347_v15 }
 0x163   : > { %v915_v17 = vpop.f32.mrb[0].mxu0 }
 0x164   : > { %v435_v18 = vpop.f32.mrb[1].mxu0 }
 0x165   : > { %v971_v19 = vpack.c.bf16 %v915_v17, %v435_v18 }
 0x167   : > { %v918_v20 = vpop.f32.mrb[2].mxu0  ;;  %972 = vmatprep.subr.bf16.mxu1 %v971_v19 }
 0x168   : > { %v445_v21 = vpop.f32.mrb[3].mxu0  ;;  %974 = vmatpush3.bf16.msra.mxu1 %v971_v19 }
 0x169   : > { %v975_v22 = vpack.c.bf16 %v918_v20, %v445_v21 }
 0x16b   : > { %976 = vmatprep.subr.bf16.mxu1 %v975_v22 }
 0x16c   : > { %978 = vmatpush3.bf16.msra.mxu1 %v975_v22 }
 0x16d   : > { %980 = vmatprep.subr.bf16.mxu1 %v979_v28 }
 0x16f   : > { %928 = vmatmul.mubr.msk.f32.vlgmr.msra.gmra.mrb[0].mxu1 %vm465_vm1, %v455_v23 }
 0x170   : > { %930 = vmatprep.mubr.msk.f32.mxu1 %vm465_vm1, %v456_v24  ;;  %982 = vmatpush3.bf16.msra.mxu1 %v979_v28 }
 0x171   : > { %984 = vmatprep.subr.bf16.mxu1 %v983_v31 }
 0x173   : > { %931 = vmatmul.mubr.msk.f32.gmra.mrb[2].mxu1 %vm465_vm1, %v457_v25 }
 0x174   : > { %986 = vmatpush3.bf16.msra.mxu1 %v983_v31 }
 0x175   : > { %988 = vmatprep.subr.bf16.mxu1 %v987_v34 }
 0x178   : > { %990 = vmatpush3.bf16.msra.mxu1 %v987_v34 }
 0x179   : > { %992 = vmatprep.subr.bf16.mxu1 %v991_v37 }
 0x17c   : > { %994 = vmatpush3.bf16.msra.mxu1 %v991_v37 }
 0x242   : > { %v929_v39 = vpop.f32.mrb[0].mxu1 }
 0x243   : > { %v550_v41 = vadd.f32 %v929_v39, %v847_v38  ;;  %v544_v42 = vpop.f32.mrb[1].mxu1 }
 0x244   : > { %v545_v44 = vadd.f32 %v847_v38, %v544_v42 }
 0x245   : > { %v568_v45 = vadd.f32 %v564_v40, %v550_v41 }
 0x246   : > { %v567_v46 = vadd.f32 %v563_v43, %v545_v44  ;;  %v932_v47 = vpop.f32.mrb[2].mxu1 }
 0x247   : > { %1061 = vtanh.f32 %v568_v45  ;;  %v560_v49 = vadd.f32 %v932_v47, %v847_v38  ;;  %v554_v50 = vpop.f32.mrb[3].mxu1  ;;  %v575_v60 = vmax.f32 %v568_v45, 0.0 }
 0x248   : > { %1063 = vtanh.f32 %v567_v46  ;;  %v555_v52 = vadd.f32 %v847_v38, %v554_v50  ;;  %v574_v58 = vmax.f32 %v567_v46, 0.0 }
 0x249   : > { %v570_v54 = vadd.f32 %v566_v48, %v560_v49 }
 0x24a   : > { %v569_v55 = vadd.f32 %v565_v51, %v555_v52 }
 0x24b   : > { %1065 = vtanh.f32 %v570_v54  ;;  %v577_v2 = vmax.f32 %v570_v54, 0.0 }
 0x24c   : > { %1067 = vtanh.f32 %v569_v55  ;;  %v576_v0 = vmax.f32 %v569_v55, 0.0 }
 0x251   : > { %v1062_v57 = vpop.eup %1061 }
 0x252   : > { %v1064_v59 = vpop.eup %1063  ;;  %v583_v62 = vsel %vm573_vm2, %v575_v60, %v1062_v57 }
 0x253   : > { %v582_v61 = vsel %vm573_vm2, %v574_v58, %v1064_v59 }
 0x254   : > { %949 = vmatprep.mubr.msk.f32.mxu1 %vm356_vm0, %v582_v61 }
 0x255   : > { %v1066_v63 = vpop.eup %1065  ;;  %950 = vmatmul.mubr.msk.f32.vlgmr.msra.gmra.mrb[4].mxu1 %vm356_vm0, %v583_v62 }
 0x256   : > { %v1068_v1 = vpop.eup %1067  ;;  %v585_v4 = vsel %vm573_vm2, %v577_v2, %v1066_v63 }
 0x257   : > { %v584_v3 = vsel %vm573_vm2, %v576_v0, %v1068_v1 }
 0x258   : > { %952 = vmatprep.mubr.msk.f32.mxu1 %vm356_vm0, %v584_v3 }
 0x259   : > { %953 = vmatmul.mubr.msk.f32.gmra.mrb[6].mxu1 %vm356_vm0, %v585_v4 }
 0x328   : > { %v951_v5 = vpop.f32.mrb[4].mxu1 }
 0x329   : > { %692 = vst.msk [vmem:[%s338_s13 + $0x8] sm:$0xff] %vm465_vm1, %v951_v5  ;;  %v672_v6 = vpop.f32.mrb[5].mxu1 }
 0x32a   : > { %691 = vst.msk [vmem:[%s338_s13] sm:$0xff] %vm465_vm1, %v672_v6 }
 0x32c   : > { %v954_v7 = vpop.f32.mrb[6].mxu1 }
 0x32d   : > { %694 = vst.msk [vmem:[%s338_s13 + $0x18] sm:$0xff] %vm465_vm1, %v954_v7  ;;  %v682_v8 = vpop.f32.mrb[7].mxu1 }
 0x32e   : > { %693 = vst.msk [vmem:[%s338_s13 + $0x10] sm:$0xff] %vm465_vm1, %v682_v8 }
 0x32f   : > { %1170 = shalt.err (!%p1167_p8)
}
 0x330   : > { %s1171_s29 = scalar_lea.hbm %s1548_s7, 512  ;;  %s1175_s20 = scalar_lea.hbm %s1600_s6, 1024 }
 0x331   : > { %p1172_p10 = scmp.ne.s32.totalorder %s1548_s7, %s1171_s29  ;;  %p1176_p11 = scmp.lt.u32.totalorder %s1548_s7, %s1600_s6 }
 0x332   : > { %p1177_p13 = scmp.lt.u32.totalorder %s1175_s20, %s1171_s29  ;;  %p1179_p7 = scmp.lt.u32.totalorder %s1171_s29, %s1548_s7 }
 0x333   : > { %p1173_p0 = pnand %p1172_p10, %p1370_p12 }
 0x334   : > { %p1178_p3 = por %p1177_p13, %p1176_p11 }
 0x335   : > { %p1174_p4 = pneg %p1173_p0 }
 0x336   : > { %p1180_p9 = por %p1179_p7, %p1178_p3 }
 0x338   : > { %p1181_p1 = pnand %p1180_p9, %p1174_p4 }
 0x33a   : > { %1184 = shalt.err (!%p1181_p1)
}
 0x33b   : > { %s1239_s10 = smov 128   ;;  %s1240_s8 = smov 8  }
 0x33c   : > { %1003 = dma.vmem_to_hbm [thread:$0]  (%p1370_p12), %s1542_s26, 512, %s1548_s7, %s696_s25, %s1239_s10, %s1239_s10, %s1240_s8  }
 0x33d PF: > { %s724_s27 = sand.u32 1, %s1219_s21   ;;  %p1631_p5 = scmp.ne.s32.totalorder %s1615_s28, 0 }
 0x33e   : > { %p1632_p2 = scmp.ge.s32.totalorder %s1231_s24, 2  ;;  %s725_s13 = scalar_lea.sflag [#allocation4], %s724_s27 }
 0x340   : > { %p1017_p6 = pnand %p1632_p2, %p1631_p5 }
 0x342   : > { %1214 = dma.done.wait (!%p1017_p6), %s725_s13, 512  }
 0x343   : > { %1216 = vsyncadd (!%p1017_p6), %s725_s13, 4294966784  ;;  %s1633_s24 = sld [smem:[#allocation14_spill]]  ;;  %s1634_s15 = sld [smem:[#allocation13_spill]] }
 0x344   : > { %s1635_s23 = sld [smem:[#allocation15_spill]]  ;;  %s1636_s21 = smov %s1223_s22 }
 0x349   : > { %p22_p8 = scmp.ge.s32.totalorder %s1633_s24, 4   ;;  %s1637_s22 = smov %s1634_s15 }
 0x34b   :  { %24 = sbr.rel (!%p22_p8) target bundleno = 10 (0xa), region = 109 }
 0x352   :  { %730 = vsyncpa [#allocation3], 1 }
 0x353   :  { %732 = vsyncpa [#allocation3 + $0x1], 1 }
 0x354   :  { %733 = vsyncpa [#allocation6], 1 }
 0x355   :  { %735 = vsyncpa [#allocation6 + $0x1], 1 }
 0x356   :  { %736 = vsyncpa [#allocation4], 1 }
 0x357   :  { %738 = vsyncpa [#allocation4 + $0x1], 1 }

</bundles_post_ra>
